<compile_context>
chip_gen: v7x
topology: tpu7x:2x2x1
jax: 0.10.0
libtpu: 0.0.40
codegen_flags: <defaults>
</compile_context>

<pallas_src>
import math

import jax
import jax.numpy as jnp
from jax import lax
from jax.experimental import pallas as pl
from jax.experimental.pallas import tpu as pltpu


def _make_gsconve_kernel(H, W, lpad):
    """Fused GSConvE forward for one image: cv1 -> cv2 -> channel interleave."""
    HW = H * W
    halo = W + 1                      # max |shift| of a 3x3 tap in flat coords
    inv_sqrt2 = 1.0 / math.sqrt(2.0)

    def kernel(x_ref, w1t_ref, b1_ref, w2t_ref, w3_ref, cm_ref, o_ref,
               x1p_ref, tp_ref):
        # x_ref  : (C1, HW)           one NCHW image (bf16), spatial flat on lanes
        # w1t_ref: (c_, C1)           BN-folded 1x1 weight, pre-transposed (bf16)
        # b1_ref : (c_, 1)            folded BN bias (f32)
        # w2t_ref: (9, c_, c_)        dense 3x3 weight, (tap, out, in) (bf16)
        # w3_ref : (9, c_, 1)         depthwise 3x3 weight, (tap, channel, 1) (f32)
        # cm_ref : (2, HW)            0/1 column masks: [0]=col>=1, [1]=col<=W-2 (bf16)
        # o_ref  : (c_, 2, HW)        output: [:, 0] = x1, [:, 1] = x2
        # x1p_ref: (c_, lpad+HW+halo) bf16 scratch, flat zero halo for dense 3x3
        # tp_ref : (c_, lpad+HW+halo) f32  scratch, flat zero halo for depthwise 3x3
        c_ = w1t_ref.shape[0]

        # ---- zero ONLY the halo strips (per step; see header note) ----------
        x1p_ref[:, lpad - halo:lpad] = jnp.zeros((c_, halo), x1p_ref.dtype)
        x1p_ref[:, lpad + HW:lpad + HW + halo] = jnp.zeros((c_, halo), x1p_ref.dtype)
        tp_ref[:, lpad - halo:lpad] = jnp.zeros((c_, halo), tp_ref.dtype)
        tp_ref[:, lpad + HW:lpad + HW + halo] = jnp.zeros((c_, halo), tp_ref.dtype)

        # ---- cv1: 1x1 conv + folded BN + SiLU (MXU, f32 accumulate) ---------
        a = lax.dot_general(
            w1t_ref[...], x_ref[...],
            dimension_numbers=(((1,), (0,)), ((), ())),
            preferred_element_type=jnp.float32) + b1_ref[...]        # (c_, HW)
        x1 = a * jax.nn.sigmoid(a)                                   # f32
        o_ref[:, 0, :] = x1.astype(o_ref.dtype)                      # no transpose
        x1_bf = x1.astype(x1p_ref.dtype)
        x1p_ref[:, lpad:lpad + HW] = x1_bf                           # data window

        # column-boundary masks (0/1), broadcast along sublanes in the muls
        col_lo = cm_ref[0:1, :]                                      # (1, HW) bf16
        col_hi = cm_ref[1:2, :]

        # ---- cv2[0]: dense 3x3, stride 1, pad 1: 9 accumulated matmuls ------
        # Row out-of-range taps read the zeroed flat halo; column wrap reads
        # are killed by the 0/1 column masks.
        t = jnp.zeros((c_, HW), jnp.float32)
        for dy in range(3):
            for dx in range(3):
                s = (dy - 1) * W + (dx - 1)
                xs = x1_bf if s == 0 else x1p_ref[:, lpad + s:lpad + s + HW]
                if dx == 0:
                    xs = xs * col_lo
                elif dx == 2:
                    xs = xs * col_hi
                t = t + lax.dot_general(
                    w2t_ref[3 * dy + dx], xs,
                    dimension_numbers=(((1,), (0,)), ((), ())),
                    preferred_element_type=jnp.float32)              # (c_, HW)

        tp_ref[:, lpad:lpad + HW] = t

        # ---- cv2[1]: depthwise 3x3, pad 1 (VPU), then exact (erf) GELU ------
        acc = jnp.zeros((c_, HW), jnp.float32)
        for dy in range(3):
            for dx in range(3):
                s = (dy - 1) * W + (dx - 1)
                ts = t if s == 0 else tp_ref[:, lpad + s:lpad + s + HW]
                if dx == 0:
                    ts = ts * col_lo
                elif dx == 2:
                    ts = ts * col_hi
                acc = acc + w3_ref[3 * dy + dx] * ts                 # (c_,1)*(c_,HW)
        x2 = 0.5 * acc * (1.0 + lax.erf(acc * inv_sqrt2))            # (c_, HW)

        # ---- GSConvE channel shuffle: out[2i]=x1[i], out[2i+1]=x2[i] --------
        o_ref[:, 1, :] = x2.astype(o_ref.dtype)

    return kernel


def gsconve_forward(x_nchw, params, *, mxu_dtype=jnp.bfloat16):
    """GSConvE forward (eval-mode BN). NCHW in, NCHW out."""
    # TODO(synk): only the default k=1, s=1, g=1, d=1 cv1 configuration is implemented.
    w1 = params["w1"]          # (C1, c_)        == PyTorch cv1 weight (c_, C1, 1, 1)
    gamma = params["gamma"]    # (c_,)  BN affine / running stats (eval mode)
    beta = params["beta"]
    mean = params["mean"]
    var = params["var"]
    w2 = params["w2"]          # (3, 3, c_, c_)  HWIO == PyTorch (c_, c_, 3, 3)
    w3 = params["w3"]          # (3, 3, 1, c_)   HWIO == PyTorch (c_, 1, 3, 3)

    N, C1, H, W = x_nchw.shape
    c_ = w1.shape[1]
    HW = H * W
    eps = 1e-5

    # Fold BN (eval mode) into the 1x1 conv; pre-transpose so every in-kernel
    # matmul is a plain (M, K) x (K, N).
    inv_std = 1.0 / jnp.sqrt(var.astype(jnp.float32) + eps)
    scale = gamma.astype(jnp.float32) * inv_std                           # (c_,)
    w1t = (w1.astype(jnp.float32) * scale[None, :]).T.astype(mxu_dtype)   # (c_, C1)
    b1 = (beta.astype(jnp.float32)
          - mean.astype(jnp.float32) * scale).reshape(c_, 1)              # (c_, 1)
    w2t = jnp.transpose(w2.astype(jnp.float32), (0, 1, 3, 2)
                        ).reshape(9, c_, c_).astype(mxu_dtype)            # (tap,out,in)
    w3f = w3.astype(jnp.float32).reshape(9, c_)[:, :, None]               # (9, c_, 1)

    # Precomputed 0/1 column-boundary masks (kills row-wrap reads of the flat
    # shifted windows).  bf16 so the dense-conv operands stay bf16.
    col = jnp.arange(HW, dtype=jnp.int32) % W
    cmask = jnp.stack([(col >= 1), (col <= W - 2)]).astype(mxu_dtype)     # (2, HW)

    # Input DMA'd as bf16 — the only precision the kernel uses it at.
    xf = x_nchw.astype(mxu_dtype).reshape(N, C1, HW)                      # free reshape

    # Flat halo layout: [lpad | HW data | W+1].  lpad is rounded to a lane
    # multiple so the main data store is lane-aligned; reads only ever touch
    # the last W+1 lanes of the left halo.
    halo = W + 1
    lpad = -(-halo // 128) * 128
    padded = lpad + HW + halo

    # TODO(synk): for production-sized feature maps (e.g. 80x80, c_=64) add a grid
    # axis over row tiles with a 2-row halo and set vmem_limit_bytes explicitly so
    # each step fits the scoped VMEM budget and both v7x TensorCores are used.
    out = pl.pallas_call(
        _make_gsconve_kernel(H, W, lpad),
        out_shape=jax.ShapeDtypeStruct((N, c_, 2, HW), jnp.float32),
        grid=(N,),
        in_specs=[
            pl.BlockSpec((None, C1, HW), lambda n: (n, 0, 0)),
            pl.BlockSpec((c_, C1), lambda n: (0, 0)),
            pl.BlockSpec((c_, 1), lambda n: (0, 0)),
            pl.BlockSpec((9, c_, c_), lambda n: (0, 0, 0)),
            pl.BlockSpec((9, c_, 1), lambda n: (0, 0, 0)),
            pl.BlockSpec((2, HW), lambda n: (0, 0)),
        ],
        out_specs=pl.BlockSpec((None, c_, 2, HW), lambda n: (n, 0, 0, 0)),
        scratch_shapes=[
            pltpu.VMEM((c_, padded), mxu_dtype),     # x1 flat halo (bf16)
            pltpu.VMEM((c_, padded), jnp.float32),   # t  flat halo (f32)
        ],
        compiler_params=pltpu.CompilerParams(
            dimension_semantics=("parallel",)),
    )(xf, w1t, b1, w2t, w3f, cmask)

    # (N, c_, 2, H*W) -> (N, 2*c_, H, W): pure metadata reshape, no HBM pass.
    return out.reshape(N, 2 * c_, H, W)


def gsconve_reference(x_nchw, params, *, mxu_dtype=jnp.bfloat16):
    """Pure-JAX reference mirroring the PyTorch module (eval-mode BN) and the
    kernel's numeric policy (bf16 MXU inputs, f32 accumulate / elementwise)."""
    w1, gamma, beta = params["w1"], params["gamma"], params["beta"]
    mean, var, w2, w3 = params["mean"], params["var"], params["w2"], params["w3"]
    eps = 1e-5
    N, C1, H, W = x_nchw.shape
    c_ = w1.shape[1]

    def r(a):  # round like the kernel's MXU inputs
        return a.astype(mxu_dtype).astype(jnp.float32)

    x = jnp.transpose(x_nchw, (0, 2, 3, 1)).astype(jnp.float32)          # NHWC
    inv_std = 1.0 / jnp.sqrt(var.astype(jnp.float32) + eps)
    scale = gamma.astype(jnp.float32) * inv_std
    w1f = w1.astype(jnp.float32) * scale[None, :]
    b1 = beta.astype(jnp.float32) - mean.astype(jnp.float32) * scale

    a = jnp.einsum("nhwc,cd->nhwd", r(x), r(w1f),
                   precision=lax.Precision.HIGHEST) + b1
    x1 = a * jax.nn.sigmoid(a)

    dn = lax.conv_dimension_numbers(x1.shape, w2.shape, ("NHWC", "HWIO", "NHWC"))
    t = lax.conv_general_dilated(r(x1), r(w2), (1, 1), "SAME",
                                 dimension_numbers=dn,
                                 precision=lax.Precision.HIGHEST)
    t = lax.conv_general_dilated(t, w3.astype(jnp.float32), (1, 1), "SAME",
                                 dimension_numbers=dn, feature_group_count=c_,
                                 precision=lax.Precision.HIGHEST)
    x2 = jax.nn.gelu(t, approximate=False)

    # GSConvE shuffle: channel 2i <- x1[:, i], channel 2i+1 <- x2[:, i]
    y = jnp.stack([x1, x2], axis=-1).reshape(N, H, W, 2 * c_)
    return jnp.transpose(y, (0, 3, 1, 2))


if __name__ == "__main__":
    key = jax.random.PRNGKey(0)
    N, C1, H, W = 2, 8, 16, 16
    C2 = 8                      # GSConvE output channels
    c_ = C2 // 2

    ks = jax.random.split(key, 8)
    x = jax.random.normal(ks[0], (N, C1, H, W), jnp.float32)
    params = {
        "w1": jax.random.normal(ks[1], (C1, c_), jnp.float32) * 0.2,
        "gamma": 1.0 + 0.1 * jax.random.normal(ks[2], (c_,), jnp.float32),
        "beta": 0.1 * jax.random.normal(ks[3], (c_,), jnp.float32),
        "mean": 0.1 * jax.random.normal(ks[4], (c_,), jnp.float32),
        "var": jax.random.uniform(ks[5], (c_,), jnp.float32, minval=0.5, maxval=1.5),
        "w2": jax.random.normal(ks[6], (3, 3, c_, c_), jnp.float32) * 0.2,
        "w3": jax.random.normal(ks[7], (3, 3, 1, c_), jnp.float32) * 0.2,
    }

    out = jax.jit(gsconve_forward)(x, params)
    jax.block_until_ready(out)
    assert out.shape == (N, C2, H, W), out.shape

    ref = gsconve_reference(x, params)
    err = float(jnp.max(jnp.abs(out - ref)))
    # bf16 MXU inputs / f32 accumulation in both the kernel and the reference.
    assert jnp.allclose(out, ref, rtol=5e-3, atol=5e-3), f"max abs err = {err}"

    print("KERNEL_OK")
</pallas_src>

<mosaic_0001>
module attributes {stable_mosaic.version = 11 : i64} {
  func.func @kernel(%arg0: i32, %arg1: memref<1x8x256xbf16, #tpu.memory_space<vmem>>, %arg2: memref<4x8xbf16, #tpu.memory_space<vmem>>, %arg3: memref<4x1xf32, #tpu.memory_space<vmem>>, %arg4: memref<9x4x4xbf16, #tpu.memory_space<vmem>>, %arg5: memref<9x4x1xf32, #tpu.memory_space<vmem>>, %arg6: memref<2x256xbf16, #tpu.memory_space<vmem>>, %arg7: memref<1x4x2x256xf32, #tpu.memory_space<vmem>>, %arg8: memref<4x401xbf16, #tpu.memory_space<vmem>>, %arg9: memref<4x401xf32, #tpu.memory_space<vmem>>) attributes {dimension_semantics = [#tpu.dimension_semantics<parallel>], iteration_bounds = array<i64: 2>, scalar_prefetch = 0 : i64, scratch_operands = 2 : i64, tpu.core_type = #tpu.core_type<tc>, window_params = [{transform_indices = @transform_0, window_bounds = array<i64: 1, 8, 256>}, {pipeline_mode = #tpu.pipeline_mode<synchronous>, transform_indices = @transform_1, window_bounds = array<i64: 4, 8>}, {pipeline_mode = #tpu.pipeline_mode<synchronous>, transform_indices = @transform_2, window_bounds = array<i64: 4, 1>}, {pipeline_mode = #tpu.pipeline_mode<synchronous>, transform_indices = @transform_3, window_bounds = array<i64: 9, 4, 4>}, {pipeline_mode = #tpu.pipeline_mode<synchronous>, transform_indices = @transform_4, window_bounds = array<i64: 9, 4, 1>}, {pipeline_mode = #tpu.pipeline_mode<synchronous>, transform_indices = @transform_5, window_bounds = array<i64: 2, 256>}, {transform_indices = @transform_6, window_bounds = array<i64: 1, 4, 2, 256>}]} {
    %cst = arith.constant 0.000000e+00 : bf16
    %0 = vector.broadcast %cst : bf16 to vector<4x17xbf16>
    %c0 = arith.constant 0 : index
    %c111 = arith.constant 111 : index
    %1 = vector.load %arg8[%c0, %c111] : memref<4x401xbf16, #tpu.memory_space<vmem>>, vector<4x17xbf16>
    tpu.vector_store %arg8[%c0, %c111], %0 {strides = array<i32>} : memref<4x401xbf16, #tpu.memory_space<vmem>>, vector<4x17xbf16>,
    %cst_0 = arith.constant 0.000000e+00 : bf16
    %2 = vector.broadcast %cst_0 : bf16 to vector<4x17xbf16>
    %c0_1 = arith.constant 0 : index
    %c384 = arith.constant 384 : index
    %3 = vector.load %arg8[%c0_1, %c384] : memref<4x401xbf16, #tpu.memory_space<vmem>>, vector<4x17xbf16>
    tpu.vector_store %arg8[%c0_1, %c384], %2 {strides = array<i32>} : memref<4x401xbf16, #tpu.memory_space<vmem>>, vector<4x17xbf16>,
    %cst_2 = arith.constant 0.000000e+00 : f32
    %4 = vector.broadcast %cst_2 : f32 to vector<4x17xf32>
    %c0_3 = arith.constant 0 : index
    %c111_4 = arith.constant 111 : index
    %5 = vector.load %arg9[%c0_3, %c111_4] : memref<4x401xf32, #tpu.memory_space<vmem>>, vector<4x17xf32>
    tpu.vector_store %arg9[%c0_3, %c111_4], %4 {strides = array<i32>} : memref<4x401xf32, #tpu.memory_space<vmem>>, vector<4x17xf32>,
    %cst_5 = arith.constant 0.000000e+00 : f32
    %6 = vector.broadcast %cst_5 : f32 to vector<4x17xf32>
    %c0_6 = arith.constant 0 : index
    %c384_7 = arith.constant 384 : index
    %7 = vector.load %arg9[%c0_6, %c384_7] : memref<4x401xf32, #tpu.memory_space<vmem>>, vector<4x17xf32>
    tpu.vector_store %arg9[%c0_6, %c384_7], %6 {strides = array<i32>} : memref<4x401xf32, #tpu.memory_space<vmem>>, vector<4x17xf32>,
    %c0_8 = arith.constant 0 : index
    %c0_9 = arith.constant 0 : index
    %8 = vector.load %arg2[%c0_8, %c0_9] : memref<4x8xbf16, #tpu.memory_space<vmem>>, vector<4x8xbf16>
    %c0_10 = arith.constant 0 : index
    %c0_11 = arith.constant 0 : index
    %c0_12 = arith.constant 0 : index
    %9 = vector.load %arg1[%c0_10, %c0_11, %c0_12] : memref<1x8x256xbf16, #tpu.memory_space<vmem>>, vector<1x8x256xbf16>
    %10 = vector.shape_cast %9 : vector<1x8x256xbf16> to vector<8x256xbf16>
    %cst_13 = arith.constant dense<0.000000e+00> : vector<4x256xf32>
    %11 = tpu.matmul %8, %10, %cst_13 {dimension_numbers = #tpu.dot_dimension_numbers<[1], [0], [0], [1], [0, 0, 1, 1], [], []>} : vector<4x8xbf16>, vector<8x256xbf16>, vector<4x256xf32> -> vector<4x256xf32>
    %c0_14 = arith.constant 0 : index
    %c0_15 = arith.constant 0 : index
    %12 = vector.load %arg3[%c0_14, %c0_15] : memref<4x1xf32, #tpu.memory_space<vmem>>, vector<4x1xf32>
    %13 = vector.broadcast %12 : vector<4x1xf32> to vector<4x256xf32>
    %14 = arith.addf %11, %13 : vector<4x256xf32>
    %15 = arith.negf %14 : vector<4x256xf32>
    %16 = math.exp %15 : vector<4x256xf32>
    %cst_16 = arith.constant 1.000000e+00 : f32
    %17 = vector.broadcast %cst_16 : f32 to vector<4x256xf32>
    %18 = arith.addf %17, %16 : vector<4x256xf32>
    %19 = arith.divf %17, %18 : vector<4x256xf32>
    %20 = arith.mulf %14, %19 : vector<4x256xf32>
    %c0_17 = arith.constant 0 : index
    %c0_18 = arith.constant 0 : index
    %c0_19 = arith.constant 0 : index
    %c0_20 = arith.constant 0 : index
    %21 = vector.load %arg7[%c0_17, %c0_18, %c0_19, %c0_20] : memref<1x4x2x256xf32, #tpu.memory_space<vmem>>, vector<1x4x1x256xf32>
    %22 = vector.shape_cast %21 : vector<1x4x1x256xf32> to vector<4x256xf32>
    %23 = vector.shape_cast %20 : vector<4x256xf32> to vector<1x4x1x256xf32>
    tpu.vector_store %arg7[%c0_17, %c0_18, %c0_19, %c0_20], %23 {strides = array<i32>} : memref<1x4x2x256xf32, #tpu.memory_space<vmem>>, vector<1x4x1x256xf32>,
    %24 = arith.truncf %20 : vector<4x256xf32> to vector<4x256xbf16>
    %c0_21 = arith.constant 0 : index
    %c128 = arith.constant 128 : index
    %25 = vector.load %arg8[%c0_21, %c128] : memref<4x401xbf16, #tpu.memory_space<vmem>>, vector<4x256xbf16>
    tpu.vector_store %arg8[%c0_21, %c128], %24 {strides = array<i32>} : memref<4x401xbf16, #tpu.memory_space<vmem>>, vector<4x256xbf16>,
    %c0_22 = arith.constant 0 : index
    %c0_23 = arith.constant 0 : index
    %26 = vector.load %arg6[%c0_22, %c0_23] : memref<2x256xbf16, #tpu.memory_space<vmem>>, vector<1x256xbf16>
    %c1 = arith.constant 1 : index
    %c0_24 = arith.constant 0 : index
    %27 = vector.load %arg6[%c1, %c0_24] : memref<2x256xbf16, #tpu.memory_space<vmem>>, vector<1x256xbf16>
    %cst_25 = arith.constant 0.000000e+00 : f32
    %28 = vector.broadcast %cst_25 : f32 to vector<4x256xf32>
    %c0_26 = arith.constant 0 : index
    %c111_27 = arith.constant 111 : index
    %29 = vector.load %arg8[%c0_26, %c111_27] : memref<4x401xbf16, #tpu.memory_space<vmem>>, vector<4x256xbf16>
    %30 = vector.broadcast %26 : vector<1x256xbf16> to vector<4x256xbf16>
    %31 = arith.mulf %29, %30 : vector<4x256xbf16>
    %c0_28 = arith.constant 0 : index
    %c0_29 = arith.constant 0 : index
    %c0_30 = arith.constant 0 : index
    %32 = vector.load %arg4[%c0_28, %c0_29, %c0_30] : memref<9x4x4xbf16, #tpu.memory_space<vmem>>, vector<1x4x4xbf16>
    %33 = vector.shape_cast %32 : vector<1x4x4xbf16> to vector<4x4xbf16>
    %cst_31 = arith.constant dense<0.000000e+00> : vector<4x256xf32>
    %34 = tpu.matmul %33, %31, %cst_31 {dimension_numbers = #tpu.dot_dimension_numbers<[1], [0], [0], [1], [0, 0, 1, 1], [], []>} : vector<4x4xbf16>, vector<4x256xbf16>, vector<4x256xf32> -> vector<4x256xf32>
    %35 = arith.addf %28, %34 : vector<4x256xf32>
    %c0_32 = arith.constant 0 : index
    %c112 = arith.constant 112 : index
    %36 = vector.load %arg8[%c0_32, %c112] : memref<4x401xbf16, #tpu.memory_space<vmem>>, vector<4x256xbf16>
    %c1_33 = arith.constant 1 : index
    %c0_34 = arith.constant 0 : index
    %c0_35 = arith.constant 0 : index
    %37 = vector.load %arg4[%c1_33, %c0_34, %c0_35] : memref<9x4x4xbf16, #tpu.memory_space<vmem>>, vector<1x4x4xbf16>
    %38 = vector.shape_cast %37 : vector<1x4x4xbf16> to vector<4x4xbf16>
    %cst_36 = arith.constant dense<0.000000e+00> : vector<4x256xf32>
    %39 = tpu.matmul %38, %36, %cst_36 {dimension_numbers = #tpu.dot_dimension_numbers<[1], [0], [0], [1], [0, 0, 1, 1], [], []>} : vector<4x4xbf16>, vector<4x256xbf16>, vector<4x256xf32> -> vector<4x256xf32>
    %40 = arith.addf %35, %39 : vector<4x256xf32>
    %c0_37 = arith.constant 0 : index
    %c113 = arith.constant 113 : index
    %41 = vector.load %arg8[%c0_37, %c113] : memref<4x401xbf16, #tpu.memory_space<vmem>>, vector<4x256xbf16>
    %42 = vector.broadcast %27 : vector<1x256xbf16> to vector<4x256xbf16>
    %43 = arith.mulf %41, %42 : vector<4x256xbf16>
    %c2 = arith.constant 2 : index
    %c0_38 = arith.constant 0 : index
    %c0_39 = arith.constant 0 : index
    %44 = vector.load %arg4[%c2, %c0_38, %c0_39] : memref<9x4x4xbf16, #tpu.memory_space<vmem>>, vector<1x4x4xbf16>
    %45 = vector.shape_cast %44 : vector<1x4x4xbf16> to vector<4x4xbf16>
    %cst_40 = arith.constant dense<0.000000e+00> : vector<4x256xf32>
    %46 = tpu.matmul %45, %43, %cst_40 {dimension_numbers = #tpu.dot_dimension_numbers<[1], [0], [0], [1], [0, 0, 1, 1], [], []>} : vector<4x4xbf16>, vector<4x256xbf16>, vector<4x256xf32> -> vector<4x256xf32>
    %47 = arith.addf %40, %46 : vector<4x256xf32>
    %c0_41 = arith.constant 0 : index
    %c127 = arith.constant 127 : index
    %48 = vector.load %arg8[%c0_41, %c127] : memref<4x401xbf16, #tpu.memory_space<vmem>>, vector<4x256xbf16>
    %49 = vector.broadcast %26 : vector<1x256xbf16> to vector<4x256xbf16>
    %50 = arith.mulf %48, %49 : vector<4x256xbf16>
    %c3 = arith.constant 3 : index
    %c0_42 = arith.constant 0 : index
    %c0_43 = arith.constant 0 : index
    %51 = vector.load %arg4[%c3, %c0_42, %c0_43] : memref<9x4x4xbf16, #tpu.memory_space<vmem>>, vector<1x4x4xbf16>
    %52 = vector.shape_cast %51 : vector<1x4x4xbf16> to vector<4x4xbf16>
    %cst_44 = arith.constant dense<0.000000e+00> : vector<4x256xf32>
    %53 = tpu.matmul %52, %50, %cst_44 {dimension_numbers = #tpu.dot_dimension_numbers<[1], [0], [0], [1], [0, 0, 1, 1], [], []>} : vector<4x4xbf16>, vector<4x256xbf16>, vector<4x256xf32> -> vector<4x256xf32>
    %54 = arith.addf %47, %53 : vector<4x256xf32>
    %c4 = arith.constant 4 : index
    %c0_45 = arith.constant 0 : index
    %c0_46 = arith.constant 0 : index
    %55 = vector.load %arg4[%c4, %c0_45, %c0_46] : memref<9x4x4xbf16, #tpu.memory_space<vmem>>, vector<1x4x4xbf16>
    %56 = vector.shape_cast %55 : vector<1x4x4xbf16> to vector<4x4xbf16>
    %cst_47 = arith.constant dense<0.000000e+00> : vector<4x256xf32>
    %57 = tpu.matmul %56, %24, %cst_47 {dimension_numbers = #tpu.dot_dimension_numbers<[1], [0], [0], [1], [0, 0, 1, 1], [], []>} : vector<4x4xbf16>, vector<4x256xbf16>, vector<4x256xf32> -> vector<4x256xf32>
    %58 = arith.addf %54, %57 : vector<4x256xf32>
    %c0_48 = arith.constant 0 : index
    %c129 = arith.constant 129 : index
    %59 = vector.load %arg8[%c0_48, %c129] : memref<4x401xbf16, #tpu.memory_space<vmem>>, vector<4x256xbf16>
    %60 = vector.broadcast %27 : vector<1x256xbf16> to vector<4x256xbf16>
    %61 = arith.mulf %59, %60 : vector<4x256xbf16>
    %c5 = arith.constant 5 : index
    %c0_49 = arith.constant 0 : index
    %c0_50 = arith.constant 0 : index
    %62 = vector.load %arg4[%c5, %c0_49, %c0_50] : memref<9x4x4xbf16, #tpu.memory_space<vmem>>, vector<1x4x4xbf16>
    %63 = vector.shape_cast %62 : vector<1x4x4xbf16> to vector<4x4xbf16>
    %cst_51 = arith.constant dense<0.000000e+00> : vector<4x256xf32>
    %64 = tpu.matmul %63, %61, %cst_51 {dimension_numbers = #tpu.dot_dimension_numbers<[1], [0], [0], [1], [0, 0, 1, 1], [], []>} : vector<4x4xbf16>, vector<4x256xbf16>, vector<4x256xf32> -> vector<4x256xf32>
    %65 = arith.addf %58, %64 : vector<4x256xf32>
    %c0_52 = arith.constant 0 : index
    %c143 = arith.constant 143 : index
    %66 = vector.load %arg8[%c0_52, %c143] : memref<4x401xbf16, #tpu.memory_space<vmem>>, vector<4x256xbf16>
    %67 = vector.broadcast %26 : vector<1x256xbf16> to vector<4x256xbf16>
    %68 = arith.mulf %66, %67 : vector<4x256xbf16>
    %c6 = arith.constant 6 : index
    %c0_53 = arith.constant 0 : index
    %c0_54 = arith.constant 0 : index
    %69 = vector.load %arg4[%c6, %c0_53, %c0_54] : memref<9x4x4xbf16, #tpu.memory_space<vmem>>, vector<1x4x4xbf16>
    %70 = vector.shape_cast %69 : vector<1x4x4xbf16> to vector<4x4xbf16>
    %cst_55 = arith.constant dense<0.000000e+00> : vector<4x256xf32>
    %71 = tpu.matmul %70, %68, %cst_55 {dimension_numbers = #tpu.dot_dimension_numbers<[1], [0], [0], [1], [0, 0, 1, 1], [], []>} : vector<4x4xbf16>, vector<4x256xbf16>, vector<4x256xf32> -> vector<4x256xf32>
    %72 = arith.addf %65, %71 : vector<4x256xf32>
    %c0_56 = arith.constant 0 : index
    %c144 = arith.constant 144 : index
    %73 = vector.load %arg8[%c0_56, %c144] : memref<4x401xbf16, #tpu.memory_space<vmem>>, vector<4x256xbf16>
    %c7 = arith.constant 7 : index
    %c0_57 = arith.constant 0 : index
    %c0_58 = arith.constant 0 : index
    %74 = vector.load %arg4[%c7, %c0_57, %c0_58] : memref<9x4x4xbf16, #tpu.memory_space<vmem>>, vector<1x4x4xbf16>
    %75 = vector.shape_cast %74 : vector<1x4x4xbf16> to vector<4x4xbf16>
    %cst_59 = arith.constant dense<0.000000e+00> : vector<4x256xf32>
    %76 = tpu.matmul %75, %73, %cst_59 {dimension_numbers = #tpu.dot_dimension_numbers<[1], [0], [0], [1], [0, 0, 1, 1], [], []>} : vector<4x4xbf16>, vector<4x256xbf16>, vector<4x256xf32> -> vector<4x256xf32>
    %77 = arith.addf %72, %76 : vector<4x256xf32>
    %c0_60 = arith.constant 0 : index
    %c145 = arith.constant 145 : index
    %78 = vector.load %arg8[%c0_60, %c145] : memref<4x401xbf16, #tpu.memory_space<vmem>>, vector<4x256xbf16>
    %79 = vector.broadcast %27 : vector<1x256xbf16> to vector<4x256xbf16>
    %80 = arith.mulf %78, %79 : vector<4x256xbf16>
    %c8 = arith.constant 8 : index
    %c0_61 = arith.constant 0 : index
    %c0_62 = arith.constant 0 : index
    %81 = vector.load %arg4[%c8, %c0_61, %c0_62] : memref<9x4x4xbf16, #tpu.memory_space<vmem>>, vector<1x4x4xbf16>
    %82 = vector.shape_cast %81 : vector<1x4x4xbf16> to vector<4x4xbf16>
    %cst_63 = arith.constant dense<0.000000e+00> : vector<4x256xf32>
    %83 = tpu.matmul %82, %80, %cst_63 {dimension_numbers = #tpu.dot_dimension_numbers<[1], [0], [0], [1], [0, 0, 1, 1], [], []>} : vector<4x4xbf16>, vector<4x256xbf16>, vector<4x256xf32> -> vector<4x256xf32>
    %84 = arith.addf %77, %83 : vector<4x256xf32>
    %c0_64 = arith.constant 0 : index
    %c128_65 = arith.constant 128 : index
    %85 = vector.load %arg9[%c0_64, %c128_65] : memref<4x401xf32, #tpu.memory_space<vmem>>, vector<4x256xf32>
    tpu.vector_store %arg9[%c0_64, %c128_65], %84 {strides = array<i32>} : memref<4x401xf32, #tpu.memory_space<vmem>>, vector<4x256xf32>,
    %cst_66 = arith.constant 0.000000e+00 : f32
    %86 = vector.broadcast %cst_66 : f32 to vector<4x256xf32>
    %c0_67 = arith.constant 0 : index
    %c111_68 = arith.constant 111 : index
    %87 = vector.load %arg9[%c0_67, %c111_68] : memref<4x401xf32, #tpu.memory_space<vmem>>, vector<4x256xf32>
    %88 = arith.extf %26 : vector<1x256xbf16> to vector<1x256xf32>
    %89 = vector.broadcast %88 : vector<1x256xf32> to vector<4x256xf32>
    %90 = arith.mulf %87, %89 : vector<4x256xf32>
    %c0_69 = arith.constant 0 : index
    %c0_70 = arith.constant 0 : index
    %c0_71 = arith.constant 0 : index
    %91 = vector.load %arg5[%c0_69, %c0_70, %c0_71] : memref<9x4x1xf32, #tpu.memory_space<vmem>>, vector<1x4x1xf32>
    %92 = vector.shape_cast %91 : vector<1x4x1xf32> to vector<4x1xf32>
    %93 = vector.broadcast %92 : vector<4x1xf32> to vector<4x256xf32>
    %94 = arith.mulf %93, %90 : vector<4x256xf32>
    %95 = arith.addf %86, %94 : vector<4x256xf32>
    %c0_72 = arith.constant 0 : index
    %c112_73 = arith.constant 112 : index
    %96 = vector.load %arg9[%c0_72, %c112_73] : memref<4x401xf32, #tpu.memory_space<vmem>>, vector<4x256xf32>
    %c1_74 = arith.constant 1 : index
    %c0_75 = arith.constant 0 : index
    %c0_76 = arith.constant 0 : index
    %97 = vector.load %arg5[%c1_74, %c0_75, %c0_76] : memref<9x4x1xf32, #tpu.memory_space<vmem>>, vector<1x4x1xf32>
    %98 = vector.shape_cast %97 : vector<1x4x1xf32> to vector<4x1xf32>
    %99 = vector.broadcast %98 : vector<4x1xf32> to vector<4x256xf32>
    %100 = arith.mulf %99, %96 : vector<4x256xf32>
    %101 = arith.addf %95, %100 : vector<4x256xf32>
    %c0_77 = arith.constant 0 : index
    %c113_78 = arith.constant 113 : index
    %102 = vector.load %arg9[%c0_77, %c113_78] : memref<4x401xf32, #tpu.memory_space<vmem>>, vector<4x256xf32>
    %103 = arith.extf %27 : vector<1x256xbf16> to vector<1x256xf32>
    %104 = vector.broadcast %103 : vector<1x256xf32> to vector<4x256xf32>
    %105 = arith.mulf %102, %104 : vector<4x256xf32>
    %c2_79 = arith.constant 2 : index
    %c0_80 = arith.constant 0 : index
    %c0_81 = arith.constant 0 : index
    %106 = vector.load %arg5[%c2_79, %c0_80, %c0_81] : memref<9x4x1xf32, #tpu.memory_space<vmem>>, vector<1x4x1xf32>
    %107 = vector.shape_cast %106 : vector<1x4x1xf32> to vector<4x1xf32>
    %108 = vector.broadcast %107 : vector<4x1xf32> to vector<4x256xf32>
    %109 = arith.mulf %108, %105 : vector<4x256xf32>
    %110 = arith.addf %101, %109 : vector<4x256xf32>
    %c0_82 = arith.constant 0 : index
    %c127_83 = arith.constant 127 : index
    %111 = vector.load %arg9[%c0_82, %c127_83] : memref<4x401xf32, #tpu.memory_space<vmem>>, vector<4x256xf32>
    %112 = arith.extf %26 : vector<1x256xbf16> to vector<1x256xf32>
    %113 = vector.broadcast %112 : vector<1x256xf32> to vector<4x256xf32>
    %114 = arith.mulf %111, %113 : vector<4x256xf32>
    %c3_84 = arith.constant 3 : index
    %c0_85 = arith.constant 0 : index
    %c0_86 = arith.constant 0 : index
    %115 = vector.load %arg5[%c3_84, %c0_85, %c0_86] : memref<9x4x1xf32, #tpu.memory_space<vmem>>, vector<1x4x1xf32>
    %116 = vector.shape_cast %115 : vector<1x4x1xf32> to vector<4x1xf32>
    %117 = vector.broadcast %116 : vector<4x1xf32> to vector<4x256xf32>
    %118 = arith.mulf %117, %114 : vector<4x256xf32>
    %119 = arith.addf %110, %118 : vector<4x256xf32>
    %c4_87 = arith.constant 4 : index
    %c0_88 = arith.constant 0 : index
    %c0_89 = arith.constant 0 : index
    %120 = vector.load %arg5[%c4_87, %c0_88, %c0_89] : memref<9x4x1xf32, #tpu.memory_space<vmem>>, vector<1x4x1xf32>
    %121 = vector.shape_cast %120 : vector<1x4x1xf32> to vector<4x1xf32>
    %122 = vector.broadcast %121 : vector<4x1xf32> to vector<4x256xf32>
    %123 = arith.mulf %122, %84 : vector<4x256xf32>
    %124 = arith.addf %119, %123 : vector<4x256xf32>
    %c0_90 = arith.constant 0 : index
    %c129_91 = arith.constant 129 : index
    %125 = vector.load %arg9[%c0_90, %c129_91] : memref<4x401xf32, #tpu.memory_space<vmem>>, vector<4x256xf32>
    %126 = arith.extf %27 : vector<1x256xbf16> to vector<1x256xf32>
    %127 = vector.broadcast %126 : vector<1x256xf32> to vector<4x256xf32>
    %128 = arith.mulf %125, %127 : vector<4x256xf32>
    %c5_92 = arith.constant 5 : index
    %c0_93 = arith.constant 0 : index
    %c0_94 = arith.constant 0 : index
    %129 = vector.load %arg5[%c5_92, %c0_93, %c0_94] : memref<9x4x1xf32, #tpu.memory_space<vmem>>, vector<1x4x1xf32>
    %130 = vector.shape_cast %129 : vector<1x4x1xf32> to vector<4x1xf32>
    %131 = vector.broadcast %130 : vector<4x1xf32> to vector<4x256xf32>
    %132 = arith.mulf %131, %128 : vector<4x256xf32>
    %133 = arith.addf %124, %132 : vector<4x256xf32>
    %c0_95 = arith.constant 0 : index
    %c143_96 = arith.constant 143 : index
    %134 = vector.load %arg9[%c0_95, %c143_96] : memref<4x401xf32, #tpu.memory_space<vmem>>, vector<4x256xf32>
    %135 = arith.extf %26 : vector<1x256xbf16> to vector<1x256xf32>
    %136 = vector.broadcast %135 : vector<1x256xf32> to vector<4x256xf32>
    %137 = arith.mulf %134, %136 : vector<4x256xf32>
    %c6_97 = arith.constant 6 : index
    %c0_98 = arith.constant 0 : index
    %c0_99 = arith.constant 0 : index
    %138 = vector.load %arg5[%c6_97, %c0_98, %c0_99] : memref<9x4x1xf32, #tpu.memory_space<vmem>>, vector<1x4x1xf32>
    %139 = vector.shape_cast %138 : vector<1x4x1xf32> to vector<4x1xf32>
    %140 = vector.broadcast %139 : vector<4x1xf32> to vector<4x256xf32>
    %141 = arith.mulf %140, %137 : vector<4x256xf32>
    %142 = arith.addf %133, %141 : vector<4x256xf32>
    %c0_100 = arith.constant 0 : index
    %c144_101 = arith.constant 144 : index
    %143 = vector.load %arg9[%c0_100, %c144_101] : memref<4x401xf32, #tpu.memory_space<vmem>>, vector<4x256xf32>
    %c7_102 = arith.constant 7 : index
    %c0_103 = arith.constant 0 : index
    %c0_104 = arith.constant 0 : index
    %144 = vector.load %arg5[%c7_102, %c0_103, %c0_104] : memref<9x4x1xf32, #tpu.memory_space<vmem>>, vector<1x4x1xf32>
    %145 = vector.shape_cast %144 : vector<1x4x1xf32> to vector<4x1xf32>
    %146 = vector.broadcast %145 : vector<4x1xf32> to vector<4x256xf32>
    %147 = arith.mulf %146, %143 : vector<4x256xf32>
    %148 = arith.addf %142, %147 : vector<4x256xf32>
    %c0_105 = arith.constant 0 : index
    %c145_106 = arith.constant 145 : index
    %149 = vector.load %arg9[%c0_105, %c145_106] : memref<4x401xf32, #tpu.memory_space<vmem>>, vector<4x256xf32>
    %150 = arith.extf %27 : vector<1x256xbf16> to vector<1x256xf32>
    %151 = vector.broadcast %150 : vector<1x256xf32> to vector<4x256xf32>
    %152 = arith.mulf %149, %151 : vector<4x256xf32>
    %c8_107 = arith.constant 8 : index
    %c0_108 = arith.constant 0 : index
    %c0_109 = arith.constant 0 : index
    %153 = vector.load %arg5[%c8_107, %c0_108, %c0_109] : memref<9x4x1xf32, #tpu.memory_space<vmem>>, vector<1x4x1xf32>
    %154 = vector.shape_cast %153 : vector<1x4x1xf32> to vector<4x1xf32>
    %155 = vector.broadcast %154 : vector<4x1xf32> to vector<4x256xf32>
    %156 = arith.mulf %155, %152 : vector<4x256xf32>
    %157 = arith.addf %148, %156 : vector<4x256xf32>
    %cst_110 = arith.constant 5.000000e-01 : f32
    %158 = vector.broadcast %cst_110 : f32 to vector<4x256xf32>
    %159 = arith.mulf %158, %157 : vector<4x256xf32>
    %cst_111 = arith.constant 0.707106769 : f32
    %160 = vector.broadcast %cst_111 : f32 to vector<4x256xf32>
    %161 = arith.mulf %157, %160 : vector<4x256xf32>
    %162 = math.erf %161 : vector<4x256xf32>
    %cst_112 = arith.constant 1.000000e+00 : f32
    %163 = vector.broadcast %cst_112 : f32 to vector<4x256xf32>
    %164 = arith.addf %163, %162 : vector<4x256xf32>
    %165 = arith.mulf %159, %164 : vector<4x256xf32>
    %c0_113 = arith.constant 0 : index
    %c0_114 = arith.constant 0 : index
    %c1_115 = arith.constant 1 : index
    %c0_116 = arith.constant 0 : index
    %166 = vector.load %arg7[%c0_113, %c0_114, %c1_115, %c0_116] : memref<1x4x2x256xf32, #tpu.memory_space<vmem>>, vector<1x4x1x256xf32>
    %167 = vector.shape_cast %166 : vector<1x4x1x256xf32> to vector<4x256xf32>
    %168 = vector.shape_cast %165 : vector<4x256xf32> to vector<1x4x1x256xf32>
    tpu.vector_store %arg7[%c0_113, %c0_114, %c1_115, %c0_116], %168 {strides = array<i32>} : memref<1x4x2x256xf32, #tpu.memory_space<vmem>>, vector<1x4x1x256xf32>,
    return
  }
  func.func @transform_0(%arg0: i32) -> (i32, i32, i32) {
    %c0_i32 = arith.constant 0 : i32
    %c0_i32_0 = arith.constant 0 : i32
    %c0_i32_1 = arith.constant 0 : i32
    return %arg0, %c0_i32, %c0_i32_0 : i32, i32, i32
  }
  func.func @transform_1(%arg0: i32) -> (i32, i32) {
    %c0_i32 = arith.constant 0 : i32
    %c0_i32_0 = arith.constant 0 : i32
    %c0_i32_1 = arith.constant 0 : i32
    return %c0_i32, %c0_i32_0 : i32, i32
  }
  func.func @transform_2(%arg0: i32) -> (i32, i32) {
    %c0_i32 = arith.constant 0 : i32
    %c0_i32_0 = arith.constant 0 : i32
    %c0_i32_1 = arith.constant 0 : i32
    return %c0_i32, %c0_i32_0 : i32, i32
  }
  func.func @transform_3(%arg0: i32) -> (i32, i32, i32) {
    %c0_i32 = arith.constant 0 : i32
    %c0_i32_0 = arith.constant 0 : i32
    %c0_i32_1 = arith.constant 0 : i32
    %c0_i32_2 = arith.constant 0 : i32
    return %c0_i32, %c0_i32_0, %c0_i32_1 : i32, i32, i32
  }
  func.func @transform_4(%arg0: i32) -> (i32, i32, i32) {
    %c0_i32 = arith.constant 0 : i32
    %c0_i32_0 = arith.constant 0 : i32
    %c0_i32_1 = arith.constant 0 : i32
    %c0_i32_2 = arith.constant 0 : i32
    return %c0_i32, %c0_i32_0, %c0_i32_1 : i32, i32, i32
  }
  func.func @transform_5(%arg0: i32) -> (i32, i32) {
    %c0_i32 = arith.constant 0 : i32
    %c0_i32_0 = arith.constant 0 : i32
    %c0_i32_1 = arith.constant 0 : i32
    return %c0_i32, %c0_i32_0 : i32, i32
  }
  func.func @transform_6(%arg0: i32) -> (i32, i32, i32, i32) {
    %c0_i32 = arith.constant 0 : i32
    %c0_i32_0 = arith.constant 0 : i32
    %c0_i32_1 = arith.constant 0 : i32
    %c0_i32_2 = arith.constant 0 : i32
    return %arg0, %c0_i32, %c0_i32_0, %c0_i32_1 : i32, i32, i32, i32
  }
}

</mosaic_0001>

<bundles_post_ra>
// kernel: gsconve_forward.1
= control target key start
LH: loop header
LB: loop body
LE: loop exit
PB: predicated region body
PF: predicated region fallthrough
CT: control target
= control target key end

     0   :  { %s1815_s21 = smov 0   ;;  %s2148_s0 = inlined_call_operand.vmem [shape: bf16[2,8,256], index: 0, kind: input, shape index: {}]   ;;  %s2149_s1 = inlined_call_operand.vmem [shape: bf16[4,8], index: 1, kind: input, shape index: {}]   ;;  %s2150_s2 = inlined_call_operand.vmem [shape: f32[4,1], index: 2, kind: input, shape index: {}]   ;;  %s2151_s3 = inlined_call_operand.vmem [shape: bf16[9,4,4], index: 3, kind: input, shape index: {}]   ;;  %s2152_s4 = inlined_call_operand.vmem [shape: f32[9,4,1], index: 4, kind: input, shape index: {}]   ;;  %s2153_s5 = inlined_call_operand.vmem [shape: bf16[2,256], index: 5, kind: input, shape index: {}]   ;;  %s2154_s6 = inlined_call_operand.vmem [shape: f32[2,4,2,256], index: 6, kind: output, shape index: {}]  }
   0x1 LB: > { %s1629_s22 = sadd.s32 4294967295, %s1766_s21   ;;  %p1633_p0 = scmp.ge.s32.totalorder %s1766_s21, 1  ;;  %s1766_s21 = sphi %s1815_s21, %s16_s21  }
   0x2   : > { %p212_p1 = scmp.lt.s32.totalorder %s1766_s21, 3 }
   0x4   : > { %p213_p2 = pnand %p1633_p0, %p212_p1 }
   0x5   : > { %p242_p3 = scmp.lt.s32.totalorder (!%p213_p2), %s1629_s22, 1  ;;  %v346_v0 = vlaneseq (!%p213_p2)  ;;  %v1768_v1 = vmov (!%p213_p2), 0   ;;  %v263_v2 = vld [vmem:[%s2150_s2] sm:$0xf] (!%p213_p2)  ;;  %v1769_v3 = vmov (!%p213_p2), 1966171168  }
   0x6   : > { %216 = sbr.rel (%p213_p2) target bundleno = 862 (0x35e), region = 44  ;;  %317 = vmatprep.mubr.bf16.mxu0 (!%p213_p2), %v1768_v1  ;;  %1741 = vset.pattern.permute.xlu0 (!%p213_p2), %v1768_v1  ;;  %v344_v4 = vunpack.c.l.s4 (!%p213_p2), %v1769_v3  ;;  %v1842_v7 = vld [vmem:[%s2153_s5] sm:$0x3] (!%p213_p2)  ;;  %vm278_vm0 = vcmask (!%p213_p2), 1043456   ;;  %v1770_v13 = vmov (!%p213_p2), 1983009808  }
   0x7   : > { %266 = vperm.xlu0 (!%p213_p2), %1741, %v263_v2   ;;  %v1831_v5 = vshrl.u32 (!%p213_p2), %v346_v0, 7  ;;  %852 = vmatprep.mubr.bf16.mxu1 (!%p213_p2), %v1768_v1  ;;  %v439_v14 = vunpack.c.l.s4 (!%p213_p2), %v1770_v13  ;;  %v261_v16 = vld [vmem:[%s2149_s1] sm:$0x3] (!%p213_p2)  ;;  %vm274_vm1 = vcmask (!%p213_p2), 64512   ;;  %s1771_s9 = smov (!%p213_p2), 111   ;;  %s1772_s10 = smov (!%p213_p2), 1  }
   0x8   : > { %1742 = vset.pattern.permute.xlu1 (!%p213_p2), %v1768_v1  ;;  %v345_v6 = vunpack.c.0.s8 (!%p213_p2), %v344_v4  ;;  %s1773_s11 = smov (!%p213_p2), 15   ;;  %s1774_s12 = smov (!%p213_p2), 113   ;;  %vm253_vm2 = vcmask (!%p213_p2), 1042296   ;;  %vm255_vm3 = vcmask (!%p213_p2), 132096   ;;  %vm485_vm4 = vcmask (!%p213_p2), 1041408  }
   0x9   : > { %v1854_v19 = vsub.s32 (!%p213_p2), 0, %v1831_v5  ;;  %v440_v22 = vunpack.c.0.s8 (!%p213_p2), %v439_v14  ;;  %s1775_s13 = smov (!%p213_p2), 127   ;;  %s1776_s14 = smov (!%p213_p2), 17   ;;  %254 = vst.msk [vmem:[#allocation2] sm:$0x3] (!%p213_p2), %vm253_vm2, %v1768_v1  ;;  %vm1885_vm5 = vcmp.lt.s32.totalorder (!%p213_p2), %v346_v0, 256 }
   0xa   : > { %v1845_v9 = vsub.s32 (!%p213_p2), %v345_v6, %v1831_v5  ;;  %256 = vst.msk [vmem:[#allocation2 + $0x6] sm:$0x3] (!%p213_p2), %vm255_vm3, %v1768_v1  ;;  %vm481_vm6 = vcmask (!%p213_p2), 31744   ;;  %v1660_v63 = vld [vmem:[%s2151_s3 + $0x8] sm:$0x3] (!%p213_p2)  ;;  %vm754_vm7 = vcmask (!%p213_p2), 7168  }
   0xb   : > { %v1861_v29 = vsub.s32 (!%p213_p2), %v440_v22, %v1831_v5  ;;  %vm448_vm8 = vcmask (!%p213_p2), 908288   ;;  %vm666_vm9 = vcmask (!%p213_p2), 121856   ;;  %vm637_vm10 = vcmask (!%p213_p2), 924672   ;;  %s1778_s23 = smov (!%p213_p2), 112  }
   0xc   : > { %v405_v12 = vrot.slane (!%p213_p2), %v1842_v7, %v1845_v9  ;;  %vm725_vm11 = vcmask (!%p213_p2), 1039360   ;;  %vm556_vm12 = vcmask (!%p213_p2), 138240   ;;  %vm259_vm13 = vcmask (!%p213_p2), 134144  }
   0xd   : > { %s2158_s22 = smov (!%p242_p3, %s1629_s22), 1  ;;  %vm478_vm14 = vcmask 130048   ;;  %vm1061_vm15 = vcmask 916480  }
   0xe   : > { %s1689_s25 = sshll.u32 %s2158_s22, 3  ;;  %v406_v17 = vcombine.high %v405_v12, %v405_v12  ;;  %v413_v18 = vrot.slane %v405_v12, %v1845_v9  ;;  %s1690_s15 = sshll.u32 %s2158_s22, 4 }
   0xf   : > { %s246_s28 = scalar_lea.vmem %s2148_s0, %s1689_s25  ;;  %s1882_s18 = scalar_lea.vmem %s2154_s6, %s1690_s15 }
  0x10   : > { %v262_v8 = vld [vmem:[%s246_s28] sm:$0xff]  ;;  %v420_v20 = vrot.slane %v406_v17, %v1845_v9  ;;  %v422_v21 = vpack.i.b16 %v413_v18, %v413_v18  ;;  %v610_v23 = vshrl.u32 %v413_v18, 16  ;;  %s1777_s22 = smov 16  }
  0x11   : > { %v1639_v10 = vcombine.high %v262_v8, %v262_v8  ;;  %v1638_v11 = vcombine.low %v262_v8, %v262_v8 }
  0x12   : > { %v427_v24 = vrot.slane %v422_v21, %v1854_v19  ;;  %v429_v25 = vpack.i.b16 %v420_v20, %v420_v20  ;;  %v611_v26 = vpack.i.b16 %v610_v23, %v610_v23  ;;  %v617_v27 = vshrl.u32 %v420_v20, 16 }
  0x13   : > { %1640 = vmatprep.subr.msk.bf16.mxu0 %vm278_vm0, %v1639_v10  ;;  %v280_v15 = vsel %vm278_vm0, %v1638_v11, 0  ;;  %vm257_vm0 = vcmask 1044344  }
  0x14   : > { %286 = vmatpush1.bf16.msra.mxu0 %v280_v15  ;;  %v434_v28 = vrot.slane %v429_v25, %v1854_v19  ;;  %v616_v30 = vrot.slane %v611_v26, %v1854_v19  ;;  %v618_v31 = vpack.i.b16 %v617_v27, %v617_v27 }
  0x16   : > { %v437_v32 = vcombine.low %v427_v24, %v434_v28  ;;  %v623_v33 = vrot.slane %v618_v31, %v1854_v19 }
  0x17   : > { %1641 = vmatmul.mubr.msk.bf16.vlgmr.msra.gmra.mrb[0].mxu0 %vm274_vm1, %v261_v16 }
  0x18   : > { %524 = vmatprep.mubr.bf16.mxu0 %v1768_v1  ;;  %v444_v34 = vrot.slane %v437_v32, %v1861_v29  ;;  %v626_v35 = vcombine.low %v616_v30, %v623_v33 }
  0x1a   : > { %445 = vrot.lane.b32.xlu1 %v444_v34, %s1771_s9  ;;  %v633_v36 = vrot.slane %v626_v35, %v1861_v29 }
  0x1c   : > { %864 = vrot.lane.b32.xlu0 %v633_v36, %s1772_s10 }
  0x1e   : > { %950 = vrot.lane.b32.xlu1 %v444_v34, %s1773_s11 }
  0x20   : > { %634 = vrot.lane.b32.xlu0 %v633_v36, %s1774_s12 }
  0x22   : > { %722 = vrot.lane.b32.xlu1 %v444_v34, %s1775_s13 }
  0x24   : > { %1117 = vrot.lane.b32.xlu0 %v633_v36, %s1776_s14 }
  0x86   : > { %v267_v37 = vpop.permute.xlu0 %266 }
  0x8c   : > { %v446_v6 = vpop.permute.xlu1 %445 }
  0x8d   : > { %v447_v15 = vrot.slane %v446_v6, 6 }
  0x8e   : > { %v865_v60 = vpop.permute.xlu0 %864 }
  0x8f   : > { %v866_v62 = vrot.slane %v865_v60, 6  ;;  %v449_v23 = vsel %vm448_vm8, %v447_v15, %v446_v6  ;;  %v1296_v6 = vsub.s32 1, %v1831_v5  ;;  %v1779_v15 = vmov 0.0  }
  0x90   : > { %v951_v17 = vpop.permute.xlu1 %950  ;;  %260 = vst.msk [vmem:[#allocation3 + $0xc] sm:$0xf] %vm259_vm13, %v1779_v15 }
  0x91   : > { %v867_v8 = vsel %vm754_vm7, %v866_v62, %v865_v60  ;;  %v952_v20 = vrot.slane %v951_v17, 6  ;;  %258 = vst.msk [vmem:[#allocation3] sm:$0xf] %vm257_vm0, %v1779_v15 }
  0x92   : > { %v635_v33 = vpop.permute.xlu0 %634 }
  0x93   : > { %v953_v26 = vsel %vm666_vm9, %v952_v20, %v951_v17  ;;  %v636_v35 = vrot.slane %v635_v33, 6 }
  0xea   : > { %v319_v38 = vpop.f32.mrb[0].mxu0 }
  0xeb   : > { %v320_v39 = vadd.f32 %v319_v38, %v267_v37  ;;  %v321_v40 = vpop.f32.mrb[1].mxu0 }
  0xec   : > { %v322_v41 = vadd.f32 %v321_v40, %v267_v37  ;;  %v323_v42 = vpop.f32.mrb[2].mxu0 }
  0xed   : > { %v1642_v43 = vmul.f32 -1.442695, %v320_v39  ;;  %v324_v44 = vpop.f32.mrb[3].mxu0 }
  0xee   : > { %v1643_v45 = vmul.f32 -1.442695, %v322_v41 }
  0xef   : > { %1747 = vpow2.f32 %v1642_v43 }
  0xf0   : > { %1749 = vpow2.f32 %v1643_v45  ;;  %v723_v45 = vpop.permute.xlu1 %722 }
  0xf9   : > { %v1748_v46 = vpop.eup %1747 }
  0xfa   : > { %v1750_v47 = vpop.eup %1749  ;;  %v332_v48 = vadd.f32 1.0, %v1748_v46 }
  0xfb   : > { %v333_v49 = vadd.f32 1.0, %v1750_v47  ;;  %v1118_v47 = vpop.permute.xlu0 %1117 }
  0xfc   : > { %1751 = vrcp.f32 %v332_v48 }
  0xfd   : > { %1753 = vrcp.f32 %v333_v49 }
 0x106   : > { %v1752_v50 = vpop.eup %1751 }
 0x107   : > { %v1754_v51 = vpop.eup %1753  ;;  %v338_v52 = vmul.f32 %v1752_v50, %v320_v39  ;;  %v638_v39 = vsel %vm637_vm10, %v636_v35, %v635_v33  ;;  %v724_v50 = vrot.slane %v723_v45, 6  ;;  %v1679_v33 = vld [vmem:[%s2152_s4 + $0x14] sm:$0xf] }
 0x108   : > { %v339_v53 = vmul.f32 %v1754_v51, %v322_v41 }
 0x109   : > { %v382_v54 = vpack.c.bf16 %v338_v52, %v338_v52 }
 0x10a   : > { %v342_v55 = vcombine.low %v338_v52, %v339_v53  ;;  %v1647_v56 = vpack.c.bf16 %v339_v53, %v338_v52  ;;  %v383_v57 = vpack.c.bf16 %v339_v53, %v339_v53  ;;  %v1119_v52 = vrot.slane %v1118_v47, 6 }
 0x10b   : > { %v815_v58 = vsel %vm485_vm4, %v382_v54, 0 }
 0x10c   : > { %v349_v59 = vrot.slane %v342_v55, %v1845_v9  ;;  %1648 = vst.sshfl [vmem:[#allocation2 + $0x2] sm:$0x33 pattern:$0x76325410] %v1647_v56  ;;  %1661 = vmatprep.subr.msk.bf16.mxu1 %vm485_vm4, %v383_v57  ;;  %v726_v56 = vsel %vm725_vm11, %v724_v50, %v723_v45 }
 0x10d   : > { %821 = vmatpush1.bf16.msra.mxu1 %v815_v58 }
 0x10e   : > { %v350_v2 = vcombine.high %v349_v59, %v349_v59  ;;  %v357_v3 = vrot.slane %v349_v59, %v1845_v9  ;;  %v1120_v59 = vsel %vm556_vm12, %v1119_v52, %v1118_v47 }
 0x110   : > { %v364_v4 = vrot.slane %v350_v2, %v1845_v9  ;;  %v365_v0 = vcombine.high %v357_v3, %v357_v3  ;;  %375 = vst.msk [vmem:[%s1882_s18] ss:$2 sm:$0x3] %vm1885_vm5, %v357_v3  ;;  %1662 = vmatmul.mubr.msk.bf16.vlgmr.msra.gmra.mrb[0].mxu1 %vm481_vm6, %v1660_v63  ;;  %v1209_v3 = vunpack.c.l.bf16 %v1842_v7 }
 0x111   : > { %938 = vmatprep.mubr.bf16.mxu1 %v1768_v1 }
 0x112   : > { %v366_v10 = vcombine.high %v364_v4, %v364_v4  ;;  %1644 = vst.msk [vmem:[%s1882_s18 + $0x4] ss:$2 sm:$0x3] %vm1885_vm5, %v364_v4  ;;  %1645 = vst.msk [vmem:[%s1882_s18 + $0x8] ss:$2 sm:$0x3] %vm1885_vm5, %v365_v0 }
 0x113   : > { %v397_v11 = vld [vmem:[#allocation2] sm:$0x3f] }
 0x114   : > { %v863_v12 = vld [vmem:[#allocation2 + $0x2] sm:$0x3f]  ;;  %1646 = vst.msk [vmem:[%s1882_s18 + $0xc] ss:$2 sm:$0x3] %vm1885_vm5, %v366_v10  ;;  %v463_v14 = vrot.slane %v397_v11, %v1861_v29  ;;  %v456_v16 = vcombine.high %v397_v11, %v397_v11  ;;  %v451_v27 = vmul.bf16 %v449_v23, %v397_v11 }
 0x115   : > { %v869_v13 = vmul.bf16 %v867_v8, %v863_v12  ;;  %v949_v25 = vld [vmem:[#allocation2 + $0x2] sm:$0x3f]  ;;  %v1300_v8 = vsub.s32 3, %v1831_v5  ;;  %v1297_v12 = vrot.slane %v1209_v3, %v1296_v6  ;;  %v1677_v23 = vld [vmem:[%s2152_s4 + $0xc] sm:$0xf] }
 0x116   : > { %472 = vrot.lane.b32.xlu1 %v463_v14, %s1777_s22  ;;  %v471_v18 = vcombine.high %v463_v14, %v463_v14  ;;  %v470_v21 = vrot.slane %v456_v16, %v1861_v29  ;;  %v955_v30 = vmul.bf16 %v953_v26, %v949_v25  ;;  %v534_v32 = vcombine.high %v451_v27, %v451_v27  ;;  %v609_v38 = vld [vmem:[#allocation2] sm:$0x3f] }
 0x117   : > { %v880_v22 = vrot.slane %v869_v13, %v1861_v29  ;;  %v873_v24 = vcombine.high %v869_v13, %v869_v13  ;;  %v541_v34 = vrot.slane %v451_v27, %v1861_v29  ;;  %v640_v42 = vmul.bf16 %v638_v39, %v609_v38  ;;  %v1035_v44 = vld [vmem:[#allocation2 + $0x2] sm:$0x3f] }
 0x118   : > { %474 = vrot.lane.b32.xlu0 %v471_v18, %s1777_s22  ;;  %v966_v36 = vrot.slane %v955_v30, %v1861_v29  ;;  %v548_v37 = vrot.slane %v534_v32, %v1861_v29  ;;  %v959_v40 = vcombine.high %v955_v30, %v955_v30  ;;  %v1046_v49 = vrot.slane %v1035_v44, %v1861_v29  ;;  %v721_v55 = vld [vmem:[#allocation2] sm:$0x3f] }
 0x119   : > { %v888_v28 = vcombine.high %v880_v22, %v880_v22  ;;  %v887_v31 = vrot.slane %v873_v24, %v1861_v29  ;;  %v549_v41 = vcombine.high %v541_v34, %v541_v34  ;;  %v651_v48 = vrot.slane %v640_v42, %v1861_v29  ;;  %v1116_v58 = vld [vmem:[#allocation2 + $0x2] sm:$0x3f] }
 0x11a   : > { %476 = vrot.lane.b32.xlu1 %v470_v21, %s1777_s22  ;;  %v974_v43 = vcombine.high %v966_v36, %v966_v36  ;;  %v973_v46 = vrot.slane %v959_v40, %v1861_v29  ;;  %v1039_v51 = vcombine.high %v1035_v44, %v1035_v44  ;;  %v644_v53 = vcombine.high %v640_v42, %v640_v42  ;;  %v1682_v24 = vld [vmem:[%s2152_s4 + $0x20] sm:$0xf] }
 0x11b   : > { %v1054_v54 = vcombine.high %v1046_v49, %v1046_v49  ;;  %v728_v60 = vmul.bf16 %v726_v56, %v721_v55  ;;  %v1122_v63 = vmul.bf16 %v1120_v59, %v1116_v58  ;;  %v659_v2 = vcombine.high %v651_v48, %v651_v48  ;;  %v1241_v32 = vld [vmem:[%s2152_s4] sm:$0xf] }
 0x11c   : > { %889 = vrot.lane.b32.xlu0 %v880_v22, %s1775_s13  ;;  %v1053_v57 = vrot.slane %v1039_v51, %v1861_v29  ;;  %v658_v62 = vrot.slane %v644_v53, %v1861_v29  ;;  %v1301_v13 = vrot.slane %v1209_v3, %v1300_v8  ;;  %v1307_v17 = vrot.slane %v1297_v12, %v1296_v6  ;;  %v1675_v22 = vld [vmem:[%s2152_s4 + $0x4] sm:$0xf]  ;;  %v1649_v42 = vld [vmem:[%s2151_s3 + $0x2] sm:$0x3]  ;;  %v452_v58 = vld [vmem:[%s2151_s3] sm:$0x3] }
 0x11d   : > { %v732_v4 = vcombine.high %v728_v60, %v728_v60  ;;  %v739_v0 = vrot.slane %v728_v60, %v1861_v29  ;;  %v1133_v10 = vrot.slane %v1122_v63, %v1861_v29  ;;  %v1126_v7 = vcombine.high %v1122_v63, %v1122_v63 }
 0x11e   : > { %891 = vrot.lane.b32.xlu1 %v888_v28, %s1775_s13  ;;  %v1311_v18 = vrot.slane %v1301_v13, %v1296_v6  ;;  %v1214_v25 = vrot.slane %v1209_v3, %v1854_v19  ;;  %v1217_v26 = vsub.s32 2, %v1831_v5  ;;  %v1676_v5 = vld [vmem:[%s2152_s4 + $0x8] sm:$0xf] }
 0x11f   : > { %v746_v11 = vrot.slane %v732_v4, %v1861_v29  ;;  %v747_v14 = vcombine.high %v739_v0, %v739_v0  ;;  %v1141_v16 = vcombine.high %v1133_v10, %v1133_v10  ;;  %v1140_v20 = vrot.slane %v1126_v7, %v1861_v29  ;;  %v1681_v29 = vld [vmem:[%s2152_s4 + $0x1c] sm:$0xf] }
 0x120   : > { %893 = vrot.lane.b32.xlu0 %v887_v31, %s1775_s13  ;;  %v1314_v21 = vcombine.low %v1307_v17, %v1311_v18  ;;  %v1218_v27 = vrot.slane %v1209_v3, %v1217_v26  ;;  %v1224_v28 = vrot.slane %v1214_v25, %v1854_v19  ;;  %v1654_v17 = vld [vmem:[%s2151_s3 + $0x4] sm:$0x3]  ;;  %v1669_v18 = vld [vmem:[%s2151_s3 + $0xe] sm:$0x3] }
 0x122   : > { %550 = vrot.lane.b32.xlu1 %v541_v34, %s1776_s14  ;;  %v1228_v30 = vrot.slane %v1218_v27, %v1854_v19  ;;  %v1678_v19 = vld [vmem:[%s2152_s4 + $0x10] sm:$0xf]  ;;  %v1680_v34 = vld [vmem:[%s2152_s4 + $0x18] sm:$0xf] }
 0x124   : > { %975 = vrot.lane.b32.xlu0 %v966_v36, %s1774_s12  ;;  %v1231_v31 = vcombine.low %v1224_v28, %v1228_v30 }
 0x126   : > { %554 = vrot.lane.b32.xlu1 %v548_v37, %s1776_s14 }
 0x128   : > { %552 = vrot.lane.b32.xlu0 %v549_v41, %s1776_s14 }
 0x12a   : > { %977 = vrot.lane.b32.xlu1 %v974_v43, %s1774_s12 }
 0x12c   : > { %979 = vrot.lane.b32.xlu0 %v973_v46, %s1774_s12 }
 0x12e   : > { %660 = vrot.lane.b32.xlu1 %v651_v48, %s1773_s11 }
 0x130   : > { %1055 = vrot.lane.b32.xlu0 %v1046_v49, %s1778_s23  ;;  %v1663_v49 = vld [vmem:[%s2151_s3 + $0xa] sm:$0x3] }
 0x132   : > { %1057 = vrot.lane.b32.xlu1 %v1054_v54, %s1778_s23 }
 0x134   : > { %1059 = vrot.lane.b32.xlu0 %v1053_v57, %s1778_s23 }
 0x136   : > { %664 = vrot.lane.b32.xlu1 %v658_v62, %s1773_s11 }
 0x138   : > { %662 = vrot.lane.b32.xlu0 %v659_v2, %s1773_s11  ;;  %v1666_v2 = vld [vmem:[%s2151_s3 + $0xc] sm:$0x3] }
 0x13a   : > { %748 = vrot.lane.b32.xlu1 %v739_v0, %s1772_s10 }
 0x13c   : > { %1142 = vrot.lane.b32.xlu0 %v1133_v10, %s1771_s9 }
 0x13e   : > { %752 = vrot.lane.b32.xlu1 %v746_v11, %s1772_s10 }
 0x140   : > { %750 = vrot.lane.b32.xlu0 %v747_v14, %s1772_s10 }
 0x142   : > { %1144 = vrot.lane.b32.xlu1 %v1141_v16, %s1771_s9 }
 0x144   : > { %1146 = vrot.lane.b32.xlu0 %v1140_v20, %s1771_s9 }
 0x146   : > { %1232 = vrot.lane.b32.xlu1 %v1231_v31, %s1771_s9 }
 0x148   : > { %1315 = vrot.lane.b32.xlu0 %v1314_v21, %s1774_s12 }
 0x14a   : > { %1351 = vrot.lane.b32.xlu1 %v1231_v31, %s1775_s13 }
 0x14c   : > { %1398 = vrot.lane.b32.xlu0 %v1314_v21, %s1772_s10 }
 0x14e   : > { %1432 = vrot.lane.b32.xlu1 %v1231_v31, %s1773_s11  ;;  %v1672_v31 = vld [vmem:[%s2151_s3 + $0x10] sm:$0x3] }
 0x150   : > { %1493 = vrot.lane.b32.xlu0 %v1314_v21, %s1776_s14 }
 0x152   : > { %1244 = vperm.xlu1 %1742, %v1241_v32  }
 0x154   : > { %1271 = vperm.xlu0 %1741, %v1675_v22  }
 0x156   : > { %1328 = vperm.xlu1 %1742, %v1676_v5   ;;  %v1397_v5 = vld [vmem:[#allocation3 + $0xc] sm:$0xf] }
 0x158   : > { %1364 = vperm.xlu0 %1741, %v1677_v23  }
 0x15a   : > { %1389 = vperm.xlu1 %1742, %v1678_v19  }
 0x15c   : > { %1470 = vperm.xlu0 %1741, %v1681_v29  }
 0x15e   : > { %1410 = vperm.xlu1 %1742, %v1679_v33  }
 0x160   : > { %1505 = vperm.xlu0 %1741, %v1682_v24  }
 0x162   : > { %1444 = vperm.xlu1 %1742, %v1680_v34  }
 0x188   : > { %v473_v35 = vpop.permute.xlu1 %472 }
 0x18a   : > { %v475_v36 = vpop.permute.xlu0 %474 }
 0x18b   : > { %v479_v37 = vsel %vm478_vm14, %v473_v35, %v475_v36 }
 0x18c   : > { %v477_v38 = vpop.permute.xlu1 %476  ;;  %v487_v40 = vsel %vm485_vm4, %v479_v37, 0 }
 0x18d   : > { %v480_v39 = vsel %vm478_vm14, %v475_v36, %v477_v38  ;;  %v1431_v38 = vld [vmem:[#allocation3 + $0xc] sm:$0xf] }
 0x18e   : > { %v890_v41 = vpop.permute.xlu0 %889  ;;  %1650 = vmatprep.subr.msk.bf16.mxu0 %vm485_vm4, %v480_v39 }
 0x18f   : > { %493 = vmatpush1.bf16.msra.mxu0 %v487_v40 }
 0x190   : > { %v892_v43 = vpop.permute.xlu1 %891 }
 0x191   : > { %v895_v44 = vsel %vm725_vm11, %v890_v41, %v892_v43 }
 0x192   : > { %v894_v45 = vpop.permute.xlu0 %893  ;;  %1651 = vmatmul.mubr.msk.bf16.vlgmr.msra.gmra.mrb[4].mxu0 %vm481_vm6, %v1649_v42  ;;  %v901_v47 = vsel %vm485_vm4, %v895_v44, 0 }
 0x193   : > { %v896_v46 = vsel %vm725_vm11, %v892_v43, %v894_v45  ;;  %600 = vmatprep.mubr.bf16.mxu0 %v1768_v1 }
 0x194   : > { %v551_v48 = vpop.permute.xlu1 %550  ;;  %1664 = vmatprep.subr.msk.bf16.mxu1 %vm485_vm4, %v896_v46 }
 0x195   : > { %907 = vmatpush1.bf16.msra.mxu1 %v901_v47 }
 0x196   : > { %v976_v50 = vpop.permute.xlu0 %975 }
 0x198   : > { %v555_v51 = vpop.permute.xlu1 %554  ;;  %1665 = vmatmul.mubr.msk.bf16.vlgmr.msra.gmra.mrb[0].mxu1 %vm481_vm6, %v1663_v49 }
 0x199   : > { %1024 = vmatprep.mubr.bf16.mxu1 %v1768_v1 }
 0x19a   : > { %v553_v52 = vpop.permute.xlu0 %552 }
 0x19b   : > { %v557_v53 = vsel %vm556_vm12, %v551_v48, %v553_v52  ;;  %v558_v54 = vsel %vm556_vm12, %v553_v52, %v555_v51 }
 0x19c   : > { %v563_v55 = vsel %vm485_vm4, %v557_v53, 0  ;;  %1652 = vmatprep.subr.msk.bf16.mxu0 %vm485_vm4, %v558_v54  ;;  %v978_v56 = vpop.permute.xlu1 %977 }
 0x19d   : > { %v981_v57 = vsel %vm637_vm10, %v976_v50, %v978_v56  ;;  %569 = vmatpush1.bf16.msra.mxu0 %v563_v55 }
 0x19e   : > { %v980_v59 = vpop.permute.xlu0 %979  ;;  %v987_v62 = vsel %vm485_vm4, %v981_v57, 0 }
 0x19f   : > { %v982_v60 = vsel %vm637_vm10, %v978_v56, %v980_v59 }
 0x1a0   : > { %v661_v63 = vpop.permute.xlu1 %660  ;;  %1667 = vmatprep.subr.msk.bf16.mxu1 %vm485_vm4, %v982_v60  ;;  %1653 = vmatmul.mubr.msk.bf16.vlgmr.msra.gmra.mrb[4].mxu0 %vm481_vm6, %v452_v58 }
 0x1a1   : > { %993 = vmatpush1.bf16.msra.mxu1 %v987_v62  ;;  %710 = vmatprep.mubr.bf16.mxu0 %v1768_v1 }
 0x1a2   : > { %v1056_v3 = vpop.permute.xlu0 %1055 }
 0x1a4   : > { %v1058_v4 = vpop.permute.xlu1 %1057  ;;  %1668 = vmatmul.mubr.msk.bf16.vlgmr.msra.gmra.mrb[0].mxu1 %vm481_vm6, %v1666_v2 }
 0x1a5   : > { %v1062_v0 = vsel %vm1061_vm15, %v1056_v3, %v1058_v4  ;;  %1105 = vmatprep.mubr.bf16.mxu1 %v1768_v1 }
 0x1a6   : > { %v1060_v6 = vpop.permute.xlu0 %1059  ;;  %v1068_v10 = vsel %vm485_vm4, %v1062_v0, 0 }
 0x1a7   : > { %v1063_v8 = vsel %vm1061_vm15, %v1058_v4, %v1060_v6 }
 0x1a8   : > { %v665_v11 = vpop.permute.xlu1 %664  ;;  %1670 = vmatprep.subr.msk.bf16.mxu1 %vm485_vm4, %v1063_v8 }
 0x1a9   : > { %1074 = vmatpush1.bf16.msra.mxu1 %v1068_v10 }
 0x1aa   : > { %v663_v12 = vpop.permute.xlu0 %662 }
 0x1ab   : > { %v667_v13 = vsel %vm666_vm9, %v661_v63, %v663_v12  ;;  %v668_v7 = vsel %vm666_vm9, %v663_v12, %v665_v11 }
 0x1ac   : > { %v673_v14 = vsel %vm485_vm4, %v667_v13, 0  ;;  %1655 = vmatprep.subr.msk.bf16.mxu0 %vm485_vm4, %v668_v7  ;;  %v749_v16 = vpop.permute.xlu1 %748 }
 0x1ad   : > { %679 = vmatpush1.bf16.msra.mxu0 %v673_v14 }
 0x1ae   : > { %v1143_v20 = vpop.permute.xlu0 %1142 }
 0x1b0   : > { %1656 = vmatmul.mubr.msk.bf16.vlgmr.msra.gmra.mrb[4].mxu0 %vm481_vm6, %v1654_v17  ;;  %v753_v21 = vpop.permute.xlu1 %752  ;;  %1671 = vmatmul.mubr.msk.bf16.vlgmr.msra.gmra.mrb[0].mxu1 %vm481_vm6, %v1669_v18 }
 0x1b1   : > { %798 = vmatprep.mubr.bf16.mxu0 %v1768_v1  ;;  %1191 = vmatprep.mubr.bf16.mxu1 %v1768_v1  ;;  %v1657_v1 = vld [vmem:[%s2151_s3 + $0x6] sm:$0x3] }
 0x1b2   : > { %v751_v22 = vpop.permute.xlu0 %750 }
 0x1b3   : > { %v755_v23 = vsel %vm754_vm7, %v749_v16, %v751_v22  ;;  %v756_v29 = vsel %vm754_vm7, %v751_v22, %v753_v21  ;;  %v1465_v22 = vld [vmem:[#allocation3 + $0xc] sm:$0xf] }
 0x1b4   : > { %v761_v24 = vsel %vm485_vm4, %v755_v23, 0  ;;  %1658 = vmatprep.subr.msk.bf16.mxu0 %vm485_vm4, %v756_v29  ;;  %v1145_v25 = vpop.permute.xlu1 %1144  ;;  %v1492_v23 = vld [vmem:[#allocation3 + $0xc] sm:$0xf] }
 0x1b5   : > { %v1148_v26 = vsel %vm448_vm8, %v1143_v20, %v1145_v25  ;;  %767 = vmatpush1.bf16.msra.mxu0 %v761_v24 }
 0x1b6   : > { %v1147_v27 = vpop.permute.xlu0 %1146  ;;  %v1154_v30 = vsel %vm485_vm4, %v1148_v26, 0 }
 0x1b7   : > { %v1149_v28 = vsel %vm448_vm8, %v1145_v25, %v1147_v27 }
 0x1b8   : > { %1673 = vmatprep.subr.msk.bf16.mxu1 %vm485_vm4, %v1149_v28  ;;  %v1233_v36 = vpop.permute.xlu1 %1232 }
 0x1b9   : > { %1160 = vmatpush1.bf16.msra.mxu1 %v1154_v30  ;;  %v1234_v56 = vrot.slane %v1233_v36, 4 }
 0x1ba   : > { %v1316_v32 = vpop.permute.xlu0 %1315 }
 0x1bb   : > { %v1236_v15 = vsel %vm448_vm8, %v1234_v56, %v1233_v36  ;;  %v1317_v63 = vrot.slane %v1316_v32, 4 }
 0x1bc   : > { %1659 = vmatmul.mubr.msk.bf16.vlgmr.msra.gmra.mrb[4].mxu0 %vm481_vm6, %v1657_v1  ;;  %1674 = vmatmul.mubr.msk.bf16.vlgmr.msra.gmra.mrb[0].mxu1 %vm481_vm6, %v1672_v31  ;;  %v1352_v37 = vpop.permute.xlu1 %1351 }
 0x1bd   : > { %v1319_v3 = vsel %vm637_vm10, %v1317_v63, %v1316_v32  ;;  %v1353_v6 = vrot.slane %v1352_v37, 4 }
 0x1be   : > { %v1399_v19 = vpop.permute.xlu0 %1398 }
 0x1bf   : > { %v1400_v33 = vrot.slane %v1399_v19, 4  ;;  %v1355_v10 = vsel %vm725_vm11, %v1353_v6, %v1352_v37 }
 0x1c0   : > { %v1433_v39 = vpop.permute.xlu1 %1432 }
 0x1c1   : > { %v1401_v34 = vsel %vm754_vm7, %v1400_v33, %v1399_v19  ;;  %v1405_v35 = vmul.f32 %v1400_v33, %v1397_v5  ;;  %v1434_v40 = vrot.slane %v1433_v39, 4 }
 0x1c2   : > { %v1494_v14 = vpop.permute.xlu0 %1493 }
 0x1c3   : > { %1420 = vrot.lane.b32.xlu1 %v1405_v35, %s1775_s13  ;;  %v1435_v41 = vsel %vm666_vm9, %v1434_v40, %v1433_v39  ;;  %v1439_v42 = vmul.f32 %v1434_v40, %v1431_v38  ;;  %v1495_v17 = vrot.slane %v1494_v14, 4 }
 0x1c5   : > { %v1496_v21 = vsel %vm556_vm12, %v1495_v17, %v1494_v14  ;;  %v1500_v24 = vmul.f32 %v1495_v17, %v1492_v23 }
 0x1c7   : > { %1454 = vrot.lane.b32.xlu1 %v1439_v42, %s1774_s12 }
 0x1d1   : > { %v1245_v28 = vpop.permute.xlu1 %1244 }
 0x1d3   : > { %v1272_v31 = vpop.permute.xlu0 %1271 }
 0x1d5   : > { %v1329_v30 = vpop.permute.xlu1 %1328 }
 0x1d7   : > { %v1365_v5 = vpop.permute.xlu0 %1364 }
 0x1d9   : > { %v1390_v1 = vpop.permute.xlu1 %1389 }
 0x1db   : > { %v2104_v33 = vpop.permute.xlu0 %1470 }
 0x1dd   : > { %v1411_v32 = vpop.permute.xlu1 %1410 }
 0x1df   : > { %v2106_v35 = vpop.permute.xlu0 %1505 }
 0x1e1   : > { %v1445_v19 = vpop.permute.xlu1 %1444 }
 0x28f   : > { %v800_v43 = vpop.f32.mrb[4].mxu0  ;;  %v1193_v44 = vpop.f32.mrb[0].mxu1 }
 0x290   : > { %v2070_v45 = vadd.f32 %v1193_v44, %v800_v43  ;;  %v802_v46 = vpop.f32.mrb[5].mxu0  ;;  %v1195_v47 = vpop.f32.mrb[1].mxu1 }
 0x291   : > { %v2072_v48 = vadd.f32 %v1195_v47, %v802_v46  ;;  %v804_v49 = vpop.f32.mrb[6].mxu0  ;;  %v1197_v50 = vpop.f32.mrb[2].mxu1 }
 0x292   : > { %v805_v51 = vpop.f32.mrb[7].mxu0  ;;  %v1198_v52 = vpop.f32.mrb[3].mxu1 }
 0x293   : > { %v1204_v53 = vcombine.low %v2070_v45, %v2072_v48  ;;  %v1759_v20 = vcombine.low %v2072_v48, %v2072_v48  ;;  %v1393_v17 = vmul.f32 %v2072_v48, %v1390_v1 }
 0x295   : > { %1206 = vst [vmem:[#allocation3 + $0x4] sm:$0xff] %v1204_v53  ;;  %v1404_v54 = vmul.f32 %v1401_v34, %v1204_v53  ;;  %v1438_v55 = vmul.f32 %v1435_v41, %v1204_v53  ;;  %v1499_v29 = vmul.f32 %v1496_v21, %v1204_v53  ;;  %v1421_v34 = vpop.permute.xlu1 %1420 }
 0x297   : > { %v1415_v25 = vcombine.high %v1404_v54, %v1404_v54  ;;  %v1449_v26 = vcombine.high %v1438_v55, %v1438_v55  ;;  %v1510_v27 = vcombine.high %v1499_v29, %v1499_v29 }
 0x299   : > { %v1455_v36 = vpop.permute.xlu1 %1454 }
 0x29c   : > { %v1265_v57 = vld [vmem:[#allocation3] sm:$0xff]  ;;  %v1208_v59 = vld [vmem:[#allocation3 + $0x8] sm:$0xf] }
 0x29d   : > { %1277 = vrot.lane.b32.xlu0 %v1265_v57, %s1777_s22  ;;  %v1239_v58 = vmul.f32 %v1265_v57, %v1236_v15  ;;  %v1266_v60 = vld [vmem:[#allocation3 + $0x8] sm:$0xf]  ;;  %v1240_v62 = vmul.f32 %v1234_v56, %v1208_v59  ;;  %v1276_v2 = vcombine.high %v1265_v57, %v1265_v57  ;;  %v1322_v4 = vmul.f32 %v1319_v3, %v1265_v57 }
 0x29e   : > { %v1293_v0 = vld [vmem:[#allocation3 + $0x8] sm:$0xf]  ;;  %v1358_v11 = vmul.f32 %v1355_v10, %v1265_v57 }
 0x29f   : > { %1250 = vrot.lane.b32.xlu1 %v1239_v58, %s1776_s14  ;;  %v1323_v8 = vmul.f32 %v1317_v63, %v1293_v0  ;;  %v1350_v12 = vld [vmem:[#allocation3 + $0x8] sm:$0xf]  ;;  %v1333_v13 = vcombine.high %v1322_v4, %v1322_v4  ;;  %v1249_v18 = vcombine.high %v1239_v58, %v1239_v58 }
 0x2a0   : > { %v1359_v7 = vmul.f32 %v1353_v6, %v1350_v12  ;;  %v1369_v16 = vcombine.high %v1358_v11, %v1358_v11 }
 0x2a1   : > { %1281 = vrot.lane.b32.xlu0 %v1266_v60, %s1777_s22 }
 0x2a3   : > { %1254 = vrot.lane.b32.xlu1 %v1240_v62, %s1776_s14 }
 0x2a5   : > { %1476 = vrot.lane.b32.xlu0 %v1204_v53, %s1778_s23 }
 0x2a7   : > { %1279 = vrot.lane.b32.xlu1 %v1276_v2, %s1777_s22 }
 0x2a9   : > { %1334 = vrot.lane.b32.xlu0 %v1322_v4, %s1773_s11 }
 0x2ab   : > { %1416 = vrot.lane.b32.xlu1 %v1404_v54, %s1775_s13 }
 0x2ad   : > { %1338 = vrot.lane.b32.xlu0 %v1323_v8, %s1773_s11 }
 0x2af   : > { %1450 = vrot.lane.b32.xlu1 %v1438_v55, %s1774_s12 }
 0x2b1   : > { %1370 = vrot.lane.b32.xlu0 %v1358_v11, %s1772_s10 }
 0x2b3   : > { %1336 = vrot.lane.b32.xlu1 %v1333_v13, %s1773_s11 }
 0x2b5   : > { %1374 = vrot.lane.b32.xlu0 %v1359_v7, %s1772_s10 }
 0x2b7   : > { %1372 = vrot.lane.b32.xlu1 %v1369_v16, %s1772_s10  ;;  %v1392_v16 = vmul.f32 %v2070_v45, %v1390_v1 }
 0x2b9   : > { %1252 = vrot.lane.b32.xlu0 %v1249_v18, %s1776_s14 }
 0x2bb   : > { %1478 = vrot.lane.b32.xlu1 %v1759_v20, %s1778_s23 }
 0x2bd   : > { %1480 = vrot.lane.b32.xlu0 %v1465_v22, %s1778_s23 }
 0x2bf   : > { %1511 = vrot.lane.b32.xlu1 %v1499_v29, %s1771_s9 }
 0x2c1   : > { %1418 = vrot.lane.b32.xlu0 %v1415_v25, %s1775_s13 }
 0x2c3   : > { %1515 = vrot.lane.b32.xlu1 %v1500_v24, %s1771_s9 }
 0x2c5   : > { %1452 = vrot.lane.b32.xlu0 %v1449_v26, %s1774_s12 }
 0x2c9   : > { %1513 = vrot.lane.b32.xlu0 %v1510_v27, %s1771_s9 }
 0x30f   : > { %v1278_v37 = vpop.permute.xlu0 %1277 }
 0x311   : > { %v1251_v38 = vpop.permute.xlu1 %1250 }
 0x313   : > { %v1282_v39 = vpop.permute.xlu0 %1281 }
 0x315   : > { %v1255_v40 = vpop.permute.xlu1 %1254 }
 0x317   : > { %v1477_v41 = vpop.permute.xlu0 %1476 }
 0x319   : > { %v1280_v42 = vpop.permute.xlu1 %1279 }
 0x31a   : > { %v1284_v53 = vsel %vm478_vm14, %v1278_v37, %v1280_v42  ;;  %v1285_v54 = vsel %vm478_vm14, %v1280_v42, %v1282_v39 }
 0x31b   : > { %v1335_v43 = vpop.permute.xlu0 %1334  ;;  %v1288_v59 = vmul.f32 %v1284_v53, %v1272_v31  ;;  %v1289_v60 = vmul.f32 %v1285_v54, %v1272_v31 }
 0x31d   : > { %v1417_v44 = vpop.permute.xlu1 %1416 }
 0x31f   : > { %v1339_v46 = vpop.permute.xlu0 %1338 }
 0x321   : > { %v1451_v47 = vpop.permute.xlu1 %1450 }
 0x323   : > { %v1371_v49 = vpop.permute.xlu0 %1370 }
 0x325   : > { %v1337_v50 = vpop.permute.xlu1 %1336 }
 0x326   : > { %v1341_v56 = vsel %vm666_vm9, %v1335_v43, %v1337_v50  ;;  %v1342_v15 = vsel %vm666_vm9, %v1337_v50, %v1339_v46 }
 0x327   : > { %v1375_v51 = vpop.permute.xlu0 %1374  ;;  %v1345_v4 = vmul.f32 %v1341_v56, %v1329_v30  ;;  %v1346_v0 = vmul.f32 %v1342_v15, %v1329_v30 }
 0x329   : > { %v1373_v52 = vpop.permute.xlu1 %1372 }
 0x32a   : > { %v1377_v2 = vsel %vm754_vm7, %v1371_v49, %v1373_v52  ;;  %v1378_v3 = vsel %vm754_vm7, %v1373_v52, %v1375_v51 }
 0x32b   : > { %v1253_v55 = vpop.permute.xlu0 %1252  ;;  %v1381_v12 = vmul.f32 %v1377_v2, %v1365_v5  ;;  %v1382_v13 = vmul.f32 %v1378_v3, %v1365_v5 }
 0x32c   : > { %v1257_v57 = vsel %vm556_vm12, %v1251_v38, %v1253_v55  ;;  %v1258_v58 = vsel %vm556_vm12, %v1253_v55, %v1255_v40 }
 0x32d   : > { %v1261_v62 = vmul.f32 %v1257_v57, %v1245_v28  ;;  %v1262_v63 = vmul.f32 %v1258_v58, %v1245_v28  ;;  %v1479_v10 = vpop.permute.xlu1 %1478 }
 0x32e   : > { %v1483_v30 = vsel %vm1061_vm15, %v1477_v41, %v1479_v10 }
 0x32f   : > { %v1290_v6 = vadd.f32 %v1288_v59, %v1261_v62  ;;  %v1291_v8 = vadd.f32 %v1289_v60, %v1262_v63  ;;  %v1481_v11 = vpop.permute.xlu0 %1480 }
 0x330   : > { %v1484_v31 = vsel %vm1061_vm15, %v1479_v10, %v1481_v11 }
 0x331   : > { %v1347_v7 = vadd.f32 %v1345_v4, %v1290_v6  ;;  %v1348_v14 = vadd.f32 %v1346_v0, %v1291_v8  ;;  %v1512_v29 = vpop.permute.xlu1 %1511  ;;  %v1488_v39 = vmul.f32 %v1484_v31, %v2104_v33 }
 0x333   : > { %v1383_v18 = vadd.f32 %v1381_v12, %v1347_v7  ;;  %v1384_v20 = vadd.f32 %v1382_v13, %v1348_v14  ;;  %v1419_v21 = vpop.permute.xlu0 %1418 }
 0x334   : > { %v1422_v22 = vsel %vm725_vm11, %v1417_v44, %v1419_v21  ;;  %v1423_v23 = vsel %vm725_vm11, %v1419_v21, %v1421_v34  ;;  %v1487_v34 = vmul.f32 %v1483_v30, %v2104_v33 }
 0x335   : > { %v1394_v24 = vadd.f32 %v1392_v16, %v1383_v18  ;;  %v1395_v25 = vadd.f32 %v1393_v17, %v1384_v20  ;;  %v1426_v26 = vmul.f32 %v1422_v22, %v1411_v32  ;;  %v1427_v27 = vmul.f32 %v1423_v23, %v1411_v32  ;;  %v1516_v32 = vpop.permute.xlu1 %1515 }
 0x337   : > { %v1453_v28 = vpop.permute.xlu0 %1452  ;;  %v1428_v1 = vadd.f32 %v1426_v26, %v1394_v24  ;;  %v1429_v5 = vadd.f32 %v1427_v27, %v1395_v25 }
 0x338   : > { %v1456_v45 = vsel %vm637_vm10, %v1451_v47, %v1453_v28  ;;  %v1457_v48 = vsel %vm637_vm10, %v1453_v28, %v1455_v36 }
 0x339   : > { %v1460_v37 = vmul.f32 %v1456_v45, %v1445_v19  ;;  %v1461_v38 = vmul.f32 %v1457_v48, %v1445_v19 }
 0x33b   : > { %v1462_v40 = vadd.f32 %v1460_v37, %v1428_v1  ;;  %v1463_v42 = vadd.f32 %v1461_v38, %v1429_v5  ;;  %v1514_v43 = vpop.permute.xlu0 %1513 }
 0x33c   : > { %v1517_v41 = vsel %vm448_vm8, %v1512_v29, %v1514_v43  ;;  %v1518_v44 = vsel %vm448_vm8, %v1514_v43, %v1516_v32 }
 0x33d   : > { %v1489_v46 = vadd.f32 %v1487_v34, %v1462_v40  ;;  %v1490_v47 = vadd.f32 %v1488_v39, %v1463_v42  ;;  %v1521_v36 = vmul.f32 %v1517_v41, %v2106_v35  ;;  %v1522_v49 = vmul.f32 %v1518_v44, %v2106_v35 }
 0x33f   : > { %v1523_v50 = vadd.f32 %v1521_v36, %v1489_v46  ;;  %v1524_v19 = vadd.f32 %v1522_v49, %v1490_v47 }
 0x341   : > { %v1527_v51 = vmul.f32 0.70710677, %v1523_v50  ;;  %v1528_v52 = vmul.f32 0.70710677, %v1524_v19  ;;  %v1525_v54 = vmul.f32 0.5, %v1523_v50  ;;  %v1526_v56 = vmul.f32 0.5, %v1524_v19 }
 0x343   : > { %1755 = verf.f32 %v1527_v51 }
 0x344   : > { %1757 = verf.f32 %v1528_v52 }
 0x34d   : > { %v1756_v33 = vpop.eup %1755 }
 0x34e   : > { %v1758_v53 = vpop.eup %1757  ;;  %v1531_v55 = vadd.f32 1.0, %v1756_v33 }
 0x34f   : > { %v1532_v15 = vadd.f32 1.0, %v1758_v53 }
 0x350   : > { %v1533_v57 = vmul.f32 %v1531_v55, %v1525_v54 }
 0x351   : > { %v1534_v58 = vmul.f32 %v1532_v15, %v1526_v56 }
 0x353   : > { %v1537_v59 = vcombine.low %v1533_v57, %v1534_v58 }
 0x355   : > { %v1544_v35 = vrot.slane %v1537_v59, %v1845_v9 }
 0x357   : > { %v1545_v60 = vcombine.high %v1544_v35, %v1544_v35  ;;  %v1552_v62 = vrot.slane %v1544_v35, %v1845_v9 }
 0x359   : > { %v1559_v63 = vrot.slane %v1545_v60, %v1845_v9  ;;  %v1560_v2 = vcombine.high %v1552_v62, %v1552_v62  ;;  %1683 = vst.msk [vmem:[%s1882_s18 + $0x1] ss:$2 sm:$0x3] %vm1885_vm5, %v1552_v62 }
 0x35b   : > { %v1561_v3 = vcombine.high %v1559_v63, %v1559_v63  ;;  %1684 = vst.msk [vmem:[%s1882_s18 + $0x5] ss:$2 sm:$0x3] %vm1885_vm5, %v1559_v63  ;;  %1685 = vst.msk [vmem:[%s1882_s18 + $0x9] ss:$2 sm:$0x3] %vm1885_vm5, %v1560_v2 }
 0x35d   : > { %1686 = vst.msk [vmem:[%s1882_s18 + $0xd] ss:$2 sm:$0x3] %vm1885_vm5, %v1561_v3 }
 0x35e PF: > { %s16_s21 = sadd.s32 1, %s1766_s21  }
 0x35f   : > { %p13_p4 = scmp.ge.s32.totalorder %s16_s21, 4  }
 0x361   :  { %15 = sbr.rel (!%p13_p4) target bundleno = 1 (0x1), region = 97 }

</bundles_post_ra>
